<compile_context>
chip_gen: v6e
topology: v6e:2x2x1
jax: 0.10.0
libtpu: 0.0.40
codegen_flags: <defaults>
</compile_context>

<pallas_src>
import functools
import math

import jax
import jax.numpy as jnp
from jax.experimental import pallas as pl
from jax.experimental.pallas import tpu as pltpu


def _layernorm_kernel(x_ref, g_ref, b_ref, o_ref, *, eps, hidden):
    # x_ref: (TILE_R, H); g_ref/b_ref: (1, H) float32, resident across the grid.
    x = x_ref[...].astype(jnp.float32)

    # Fused single-pass statistics: sum and sum-of-squares share the loaded x.
    s = jnp.sum(x, axis=-1, keepdims=True)
    ss = jnp.sum(x * x, axis=-1, keepdims=True)
    inv_h = 1.0 / hidden
    mean = s * inv_h
    # torch.std default is the unbiased estimator (ddof = 1).
    denom = float(max(hidden - 1, 1))
    var = (ss - s * s * inv_h) / denom
    var = jnp.maximum(var, 0.0)  # guard tiny negatives from cancellation
    std = jnp.sqrt(var)

    # eps added to std (outside the sqrt), exactly as in the PyTorch module.
    inv = pl.reciprocal(std + eps, approx=False)

    out = g_ref[...] * (x - mean) * inv + b_ref[...]
    o_ref[...] = out.astype(o_ref.dtype)


def layer_norm(x, a_2, b_2, eps=1e-6,
               vmem_tile_budget_bytes=40 * 1024 * 1024,
               max_tile_rows=1024):
    """x: (..., H); a_2, b_2: (H,). Returns same shape/dtype as x."""
    orig_shape = x.shape
    H = orig_shape[-1]
    R = int(math.prod(orig_shape[:-1])) if len(orig_shape) > 1 else 1

    x2 = x.reshape(R, H)
    # Cast params to f32 once here so the kernel doesn't re-cast every grid step.
    g2 = a_2.astype(jnp.float32).reshape(1, H)
    b2 = b_2.astype(jnp.float32).reshape(1, H)

    itemsize = jnp.dtype(x.dtype).itemsize
    # Sublane alignment: 8 rows for 32-bit, 16 rows for 16-bit packed dtypes.
    row_align = 16 if itemsize < 4 else 8

    # Budget covers double-buffered input tiles + double-buffered output tiles.
    bytes_per_row_in_flight = 4 * H * itemsize
    tr = vmem_tile_budget_bytes // max(bytes_per_row_in_flight, 1)
    tr = max(row_align, (tr // row_align) * row_align)
    tr = min(tr, max_tile_rows)
    # Don't use a tile larger than the (row-aligned) total row count.
    tr = min(tr, ((R + row_align - 1) // row_align) * row_align)

    # Pad rows up to a multiple of the tile (no ragged blocks, no tr-shrinking).
    R_pad = ((R + tr - 1) // tr) * tr
    if R_pad != R:
        x2 = jnp.pad(x2, ((0, R_pad - R), (0, 0)))

    # Explicit scoped-VMEM limit: 2x in + 2x out tiles, gamma/beta, plus slack.
    vmem_limit = 4 * tr * H * itemsize + 4 * H * 4 + (2 << 20)
    vmem_limit = min(max(vmem_limit, 16 << 20), 64 << 20)  # stay within v7x 64 MiB/TC

    # TODO(synk): for H < 128 the output is lane-sparse (masked stores); a
    # production path should pack multiple rows into the 128-lane dimension.

    kernel = functools.partial(_layernorm_kernel, eps=eps, hidden=H)

    out = pl.pallas_call(
        kernel,
        out_shape=jax.ShapeDtypeStruct((R_pad, H), x.dtype),
        grid_spec=pltpu.PrefetchScalarGridSpec(
            num_scalar_prefetch=0,
            grid=(R_pad // tr,),
            in_specs=[
                pl.BlockSpec((tr, H), lambda i: (i, 0)),
                pl.BlockSpec((1, H), lambda i: (0, 0)),
                pl.BlockSpec((1, H), lambda i: (0, 0)),
            ],
            out_specs=pl.BlockSpec((tr, H), lambda i: (i, 0)),
        ),
        compiler_params=pltpu.CompilerParams(
            dimension_semantics=("parallel",),
            vmem_limit_bytes=int(vmem_limit),
        ),
    )(x2, g2, b2)

    if R_pad != R:
        out = out[:R]
    return out.reshape(orig_shape)


if __name__ == "__main__":
    key = jax.random.PRNGKey(0)
    batch, seq, hidden = 2, 8, 32

    x = jax.random.normal(key, (batch, seq, hidden), dtype=jnp.float32)
    # nn.Parameter(torch.ones(size)) / nn.Parameter(torch.zeros(size))
    a_2 = jnp.ones((hidden,), dtype=jnp.float32)
    b_2 = jnp.zeros((hidden,), dtype=jnp.float32)

    y = layer_norm(x, a_2, b_2, eps=1e-6)
    y = jax.block_until_ready(y)

    # Reference: unbiased std (ddof=1), eps added to std — matches the module.
    mean = jnp.mean(x, axis=-1, keepdims=True)
    std = jnp.std(x, axis=-1, keepdims=True, ddof=1)
    ref = a_2 * (x - mean) / (std + 1e-6) + b_2
    assert jnp.allclose(y, ref, atol=1e-5, rtol=1e-5), "mismatch vs reference"

    print("KERNEL_OK")
</pallas_src>

<mosaic_0001>
module attributes {stable_mosaic.version = 11 : i64} {
  func.func @_layernorm_kernel(%arg0: i32, %arg1: memref<16x32xf32, #tpu.memory_space<vmem>>, %arg2: memref<1x32xf32, #tpu.memory_space<vmem>>, %arg3: memref<1x32xf32, #tpu.memory_space<vmem>>, %arg4: memref<16x32xf32, #tpu.memory_space<vmem>>) attributes {dimension_semantics = [#tpu.dimension_semantics<parallel>], iteration_bounds = array<i64: 1>, scalar_prefetch = 0 : i64, scratch_operands = 0 : i64, tpu.core_type = #tpu.core_type<tc>, window_params = [{transform_indices = @transform_0, window_bounds = array<i64: 16, 32>}, {pipeline_mode = #tpu.pipeline_mode<synchronous>, transform_indices = @transform_1, window_bounds = array<i64: 1, 32>}, {pipeline_mode = #tpu.pipeline_mode<synchronous>, transform_indices = @transform_2, window_bounds = array<i64: 1, 32>}, {transform_indices = @transform_3, window_bounds = array<i64: 16, 32>}]} {
    %c0 = arith.constant 0 : index
    %c0_0 = arith.constant 0 : index
    %0 = vector.load %arg1[%c0, %c0_0] : memref<16x32xf32, #tpu.memory_space<vmem>>, vector<16x32xf32>
    %cst = arith.constant dense<0.000000e+00> : vector<16xf32>
    %1 = vector.multi_reduction <add>, %0, %cst [1] : vector<16x32xf32> to vector<16xf32>
    %2 = vector.shape_cast %1 : vector<16xf32> to vector<16x1xf32>
    %3 = arith.mulf %0, %0 : vector<16x32xf32>
    %cst_1 = arith.constant dense<0.000000e+00> : vector<16xf32>
    %4 = vector.multi_reduction <add>, %3, %cst_1 [1] : vector<16x32xf32> to vector<16xf32>
    %5 = vector.shape_cast %4 : vector<16xf32> to vector<16x1xf32>
    %cst_2 = arith.constant 3.125000e-02 : f32
    %6 = vector.broadcast %cst_2 : f32 to vector<16x1xf32>
    %7 = arith.mulf %2, %6 : vector<16x1xf32>
    %8 = arith.mulf %2, %2 : vector<16x1xf32>
    %cst_3 = arith.constant 3.125000e-02 : f32
    %9 = vector.broadcast %cst_3 : f32 to vector<16x1xf32>
    %10 = arith.mulf %8, %9 : vector<16x1xf32>
    %11 = arith.subf %5, %10 : vector<16x1xf32>
    %cst_4 = arith.constant 3.100000e+01 : f32
    %12 = vector.broadcast %cst_4 : f32 to vector<16x1xf32>
    %13 = arith.divf %11, %12 : vector<16x1xf32>
    %cst_5 = arith.constant 0.000000e+00 : f32
    %14 = vector.broadcast %cst_5 : f32 to vector<16x1xf32>
    %15 = arith.maximumf %13, %14 : vector<16x1xf32>
    %16 = math.sqrt %15 : vector<16x1xf32>
    %cst_6 = arith.constant 9.99999997E-7 : f32
    %17 = vector.broadcast %cst_6 : f32 to vector<16x1xf32>
    %18 = arith.addf %16, %17 : vector<16x1xf32>
    %19 = tpu.reciprocal %18 : vector<16x1xf32> -> vector<16x1xf32>
    %c0_7 = arith.constant 0 : index
    %c0_8 = arith.constant 0 : index
    %20 = vector.load %arg2[%c0_7, %c0_8] : memref<1x32xf32, #tpu.memory_space<vmem>>, vector<1x32xf32>
    %21 = vector.broadcast %7 : vector<16x1xf32> to vector<16x32xf32>
    %22 = arith.subf %0, %21 : vector<16x32xf32>
    %23 = vector.broadcast %20 : vector<1x32xf32> to vector<16x32xf32>
    %24 = arith.mulf %23, %22 : vector<16x32xf32>
    %25 = vector.broadcast %19 : vector<16x1xf32> to vector<16x32xf32>
    %26 = arith.mulf %24, %25 : vector<16x32xf32>
    %c0_9 = arith.constant 0 : index
    %c0_10 = arith.constant 0 : index
    %27 = vector.load %arg3[%c0_9, %c0_10] : memref<1x32xf32, #tpu.memory_space<vmem>>, vector<1x32xf32>
    %28 = vector.broadcast %27 : vector<1x32xf32> to vector<16x32xf32>
    %29 = arith.addf %26, %28 : vector<16x32xf32>
    %c0_11 = arith.constant 0 : index
    %c0_12 = arith.constant 0 : index
    %30 = vector.load %arg4[%c0_11, %c0_12] : memref<16x32xf32, #tpu.memory_space<vmem>>, vector<16x32xf32>
    tpu.vector_store %arg4[%c0_11, %c0_12], %29 {strides = array<i32>} : memref<16x32xf32, #tpu.memory_space<vmem>>, vector<16x32xf32>,
    return
  }
  func.func @transform_0(%arg0: i32) -> (i32, i32) {
    %c0_i32 = arith.constant 0 : i32
    %c0_i32_0 = arith.constant 0 : i32
    return %arg0, %c0_i32 : i32, i32
  }
  func.func @transform_1(%arg0: i32) -> (i32, i32) {
    %c0_i32 = arith.constant 0 : i32
    %c0_i32_0 = arith.constant 0 : i32
    %c0_i32_1 = arith.constant 0 : i32
    return %c0_i32, %c0_i32_0 : i32, i32
  }
  func.func @transform_2(%arg0: i32) -> (i32, i32) {
    %c0_i32 = arith.constant 0 : i32
    %c0_i32_0 = arith.constant 0 : i32
    %c0_i32_1 = arith.constant 0 : i32
    return %c0_i32, %c0_i32_0 : i32, i32
  }
  func.func @transform_3(%arg0: i32) -> (i32, i32) {
    %c0_i32 = arith.constant 0 : i32
    %c0_i32_0 = arith.constant 0 : i32
    return %arg0, %c0_i32 : i32, i32
  }
}

</mosaic_0001>

<bundles_post_ra>
// kernel: tpu_custom_call.1
= control target key start
LH: loop header
LB: loop body
LE: loop exit
PB: predicated region body
PF: predicated region fallthrough
CT: control target
= control target key end

     0   :  { %8 = vsyncpa [#allocation3], 0  ;;  %s224_s0 = inlined_call_operand.hbm [shape: f32[16,32], index: 0, kind: input, shape index: {}]   ;;  %s225_s1 = inlined_call_operand.vmem [shape: f32[1,32], index: 1, kind: input, shape index: {}]   ;;  %s226_s2 = inlined_call_operand.vmem [shape: f32[1,32], index: 2, kind: input, shape index: {}]   ;;  %s227_s3 = inlined_call_operand.hbm [shape: f32[16,32], index: 3, kind: output, shape index: {}]  }
   0x1   :  { %9 = vsyncpa [#allocation4], 0  ;;  %s176_s12 = smov [#allocation2]  }
   0x2   :  { %s15_s13 = sshll.u32 %s176_s12, 4  ;;  %s16_s13 = int_to_ptr.vmem [resolvable:$true] %s15_s13 }
   0x3   :  { %s140_s14 = scalar_lea.vmem %s16_s13, 256  ;;  %p145_p1 = scmp.lt.s32.totalorder %s16_s13, %s16_s13 }
   0x4   :  { %p141_p0 = scmp.ne.s32.totalorder %s16_s13, %s140_s14  ;;  %p146_p2 = scmp.lt.s32.totalorder %s140_s14, %s140_s14 }
   0x6   :  { %p147_p3 = por %p146_p2, %p145_p1 }
   0x8   :  { %p148_p4 = pnand %p147_p3, %p141_p0 }
   0xa   :  { %151 = shalt.err (!%p148_p4)
}
   0xb   :  { %s177_s15 = smov 128   ;;  %s178_s16 = smov 8  }
   0xc   :  { %21 = dma.hbm_to_vmem [thread:$0]  %s224_s0, 256, %s16_s13, [#allocation3], %s177_s15, %s177_s15, %s178_s16  }
   0xd   :  { %172 = dma.done.wait [#allocation3], 256  }
   0xe   :  { %173 = vsyncadd [#allocation3], 4294967040  ;;  %vm31_vm0 = vcmask 261120   ;;  %v29_v0 = vld [vmem:[#allocation2] sm:$0xff]  ;;  %v30_v1 = vld [vmem:[#allocation2 + $0x8] sm:$0xff]  ;;  %s179_s22 = smov [#allocation5]  }
   0xf   :  { %v32_v2 = vsel %vm31_vm0, %v29_v0, 0.0  ;;  %v38_v3 = vmul.f32 %v29_v0, %v29_v0  ;;  %v39_v4 = vmul.f32 %v30_v1, %v30_v1  ;;  %v35_v6 = vsel %vm31_vm0, %v30_v1, 0.0  ;;  %v118_v36 = vld [vmem:[%s225_s1] ss:$0 sm:$0xff]  ;;  %s106_s23 = sshll.u32 %s179_s22, 4  ;;  %s107_s23 = int_to_ptr.vmem [resolvable:$true] %s106_s23 }
  0x10   :  { %33 = vadd.xlane.f32.xlu0 %v32_v2  ;;  %v119_v41 = vld [vmem:[%s226_s2] ss:$0 sm:$0xff]  ;;  %s152_s1 = scalar_lea.vmem %s107_s23, 256  ;;  %p157_p6 = scmp.lt.s32.totalorder %s107_s23, %s107_s23 }
  0x11   :  { %v40_v5 = vsel %vm31_vm0, %v38_v3, 0.0  ;;  %v43_v7 = vsel %vm31_vm0, %v39_v4, 0.0  ;;  %p153_p5 = scmp.ne.s32.totalorder %s107_s23, %s152_s1  ;;  %p158_p7 = scmp.lt.s32.totalorder %s152_s1, %s152_s1 }
  0x12   :  { %41 = vadd.xlane.f32.xlu1 %v40_v5 }
  0x13   :  { %p159_p8 = por %p158_p7, %p157_p6 }
  0x14   :  { %36 = vadd.xlane.f32.xlu0 %v35_v6 }
  0x15   :  { %p160_p9 = pnand %p159_p8, %p153_p5 }
  0x16   :  { %44 = vadd.xlane.f32.xlu1 %v43_v7 }
  0x99   :  { %v34_v8 = vpop.xlane.xlu0 %33 }
  0x9a   :  { %v48_v9 = vmul.f32 %v34_v8, %v34_v8  ;;  %v46_v34 = vmul.f32 0.03125, %v34_v8 }
  0x9b   :  { %v42_v10 = vpop.xlane.xlu1 %41 }
  0x9c   :  { %v50_v11 = vmul.f32 0.03125, %v48_v9  ;;  %v78_v35 = vsub.f32 %v29_v0, %v46_v34 }
  0x9d   :  { %v37_v12 = vpop.xlane.xlu0 %36 }
  0x9e   :  { %v52_v13 = vsub.f32 %v42_v10, %v50_v11  ;;  %v49_v14 = vmul.f32 %v37_v12, %v37_v12  ;;  %v47_v37 = vmul.f32 0.03125, %v37_v12  ;;  %v86_v38 = vmul.f32 %v118_v36, %v78_v35 }
  0x9f   :  { %v45_v15 = vpop.xlane.xlu1 %44 }
  0xa0   :  { %v55_v16 = vmul.f32 0.032258064, %v52_v13  ;;  %v51_v17 = vmul.f32 0.03125, %v49_v14  ;;  %v79_v40 = vsub.f32 %v30_v1, %v47_v37 }
  0xa2   :  { %v57_v18 = vmax.f32 %v55_v16, 0.0  ;;  %v53_v19 = vsub.f32 %v45_v15, %v51_v17  ;;  %v87_v44 = vmul.f32 %v118_v36, %v79_v40 }
  0xa4   :  { %124 = vrsqrt.f32 %v57_v18  ;;  %v56_v20 = vmul.f32 0.032258064, %v53_v19  ;;  %vm61_vm1 = vcmp.eq.f32.partialorder %v57_v18, inf  ;;  %v64_v24 = vand.u32 2147483648, %v57_v18 }
  0xa5   :  { %vm63_vm2 = vcmp.eq.f32.partialorder %v57_v18, 0.0 }
  0xa6   :  { %v58_v21 = vmax.f32 %v56_v20, 0.0 }
  0xa8   :  { %126 = vrsqrt.f32 %v58_v21  ;;  %vm68_vm3 = vcmp.eq.f32.partialorder %v58_v21, inf  ;;  %v71_v30 = vand.u32 2147483648, %v58_v21  ;;  %vm70_vm4 = vcmp.eq.f32.partialorder %v58_v21, 0.0 }
  0xb1   :  { %v125_v22 = vpop.eup %124 }
  0xb2   :  { %v60_v23 = vmul.f32 %v125_v22, %v57_v18 }
  0xb4   :  { %v62_v25 = vsel %vm61_vm1, %v57_v18, %v60_v23 }
  0xb5   :  { %v65_v26 = vsel %vm63_vm2, %v64_v24, %v62_v25  ;;  %v127_v27 = vpop.eup %126 }
  0xb6   :  { %v73_v28 = vadd.f32 1e-06, %v65_v26  ;;  %v67_v29 = vmul.f32 %v127_v27, %v58_v21 }
  0xb8   :  { %128 = vrcp.f32 %v73_v28  ;;  %v69_v31 = vsel %vm68_vm3, %v58_v21, %v67_v29 }
  0xb9   :  { %v72_v32 = vsel %vm70_vm4, %v71_v30, %v69_v31 }
  0xba   :  { %v74_v33 = vadd.f32 1e-06, %v72_v32 }
  0xbc   :  { %130 = vrcp.f32 %v74_v33 }
  0xc5   :  { %v129_v39 = vpop.eup %128 }
  0xc6   :  { %v88_v42 = vmul.f32 %v129_v39, %v86_v38 }
  0xc8   :  { %v97_v43 = vadd.f32 %v119_v41, %v88_v42 }
  0xc9   :  { %v131_v45 = vpop.eup %130 }
  0xca   :  { %99 = vst.msk [vmem:[#allocation5] sm:$0xff] %vm31_vm0, %v97_v43  ;;  %v89_v46 = vmul.f32 %v131_v45, %v87_v44 }
  0xcc   :  { %v98_v47 = vadd.f32 %v119_v41, %v89_v46 }
  0xce   :  { %100 = vst.msk [vmem:[#allocation5 + $0x8] sm:$0xff] %vm31_vm0, %v98_v47 }
  0xcf   :  { %163 = shalt.err (!%p160_p9)
}
  0xd0   :  { %112 = dma.vmem_to_hbm [thread:$0]  %s107_s23, 256, %s227_s3, [#allocation4], %s177_s15, %s177_s15, %s178_s16  }
  0xd1   :  { %174 = dma.done.wait [#allocation4], 256  }
  0xd2   :  { %175 = vsyncadd [#allocation4], 4294967040 }
  0xd3   :  { %116 = vsyncpa [#allocation3], 1 }
  0xd4   :  { %117 = vsyncpa [#allocation4], 1 }

</bundles_post_ra>
